<compile_context>
chip_gen: v7x
topology: tpu7x:2x2x1
jax: 0.10.0
libtpu: 0.0.40
codegen_flags: <defaults>
</compile_context>

<pallas_src>
import functools

import jax
import jax.numpy as jnp
from jax.experimental import pallas as pl
from jax.experimental.pallas import tpu as pltpu

INPUT_SIZE = 20
H1 = 64
H2 = 32
N_OUT = 1


def position_sizer_kernel(
    x_ref,                      # (TB, INPUT_SIZE)
    w1_ref, b1_ref,             # (INPUT_SIZE, 64), (1, 64)
    w2_ref, b2_ref,             # (64, 32),         (1, 32)
    w3_ref, b3_ref,             # (32, 1),          (1, 1)
    out_ref,                    # (TB, 1)
):
    x = x_ref[...]

    # Linear(input_size, 64) + ReLU
    a = jnp.dot(x, w1_ref[...], preferred_element_type=jnp.float32) + b1_ref[...]
    a = jnp.maximum(a, 0.0)

    # Dropout(0.1) -> identity at inference time.

    # Linear(64, 32) + ReLU
    a = jnp.dot(a, w2_ref[...], preferred_element_type=jnp.float32) + b2_ref[...]
    a = jnp.maximum(a, 0.0)

    # Linear(32, 1) + Sigmoid  (sigmoid goes to the EUP slot — free vs. VPU)
    z = jnp.dot(a, w3_ref[...], preferred_element_type=jnp.float32) + b3_ref[...]
    out_ref[...] = 0.5 + jax.nn.sigmoid(z)


def init_params(key, input_size=INPUT_SIZE):
    """Mirror PyTorch nn.Linear default init: U(-1/sqrt(fan_in), 1/sqrt(fan_in)).

    Weights are stored transposed, i.e. (in_features, out_features).
    """
    keys = jax.random.split(key, 6)

    def u(k, shape, fan_in):
        bound = 1.0 / float(fan_in) ** 0.5
        return jax.random.uniform(k, shape, jnp.float32, -bound, bound)

    return {
        "w1": u(keys[0], (input_size, H1), input_size),
        "b1": u(keys[1], (1, H1), input_size),
        "w2": u(keys[2], (H1, H2), H1),
        "b2": u(keys[3], (1, H2), H1),
        "w3": u(keys[4], (H2, N_OUT), H2),
        "b3": u(keys[5], (1, N_OUT), H2),
    }


def _reference_forward(x, p):
    """Pure-JAX reference for correctness checking."""
    a = jnp.maximum(x @ p["w1"] + p["b1"], 0.0)
    a = jnp.maximum(a @ p["w2"] + p["b2"], 0.0)
    return 0.5 + jax.nn.sigmoid(a @ p["w3"] + p["b3"])


@functools.partial(jax.jit, static_argnames=())
def position_sizer(market_features, params):
    """market_features: (batch, input_size) float32 -> (batch, 1) in (0.5, 1.5)."""
    x = market_features.astype(jnp.float32)
    B, I = x.shape

    # Batch tile: 128 rows for large batches; otherwise round B up to a
    # sublane multiple of 8 so the block shape satisfies the (8,128) rule.
    TB = 128 if B >= 128 else max(8, ((B + 7) // 8) * 8)
    B_pad = ((B + TB - 1) // TB) * TB
    if B_pad != B:
        x = jnp.pad(x, ((0, B_pad - B), (0, 0)))

    grid = (B_pad // TB,)

    # Weights/biases: whole-array VMEM blocks, resident across the batch grid.
    def whole(shape):
        return pl.BlockSpec(shape, lambda i: (0, 0))

    out_pad = pl.pallas_call(
        position_sizer_kernel,
        out_shape=jax.ShapeDtypeStruct((B_pad, N_OUT), jnp.float32),
        grid_spec=pltpu.PrefetchScalarGridSpec(
            num_scalar_prefetch=0,
            grid=grid,
            in_specs=[
                pl.BlockSpec((TB, I), lambda i: (i, 0)),          # x batch tile
                whole((I, H1)), whole((1, H1)),
                whole((H1, H2)), whole((1, H2)),
                whole((H2, N_OUT)), whole((1, N_OUT)),
            ],
            out_specs=pl.BlockSpec((TB, N_OUT), lambda i: (i, 0)),
        ),
        compiler_params=pltpu.CompilerParams(
            dimension_semantics=("parallel",),
        ),
    )(
        x,
        params["w1"], params["b1"],
        params["w2"], params["b2"],
        params["w3"], params["b3"],
    )

    return out_pad[:B]


if __name__ == "__main__":
    key = jax.random.PRNGKey(0)
    k_param, k_x = jax.random.split(key)

    batch, input_size = 2, INPUT_SIZE
    params = init_params(k_param, input_size)
    x = jax.random.normal(k_x, (batch, input_size), dtype=jnp.float32)

    out = position_sizer(x, params)
    out = jax.block_until_ready(out)

    assert out.shape == (batch, N_OUT)
    # Output is 0.5 + sigmoid(.) -> strictly inside (0.5, 1.5)
    assert bool(jnp.all(out > 0.5)) and bool(jnp.all(out < 1.5))
    # Numerical check against a pure-JAX reference
    ref = _reference_forward(x, params)
    assert bool(jnp.all(jnp.abs(out - ref) < 1e-5))
    print("KERNEL_OK")
</pallas_src>

<mosaic_0001>
module attributes {stable_mosaic.version = 11 : i64} {
  func.func @position_sizer_kernel(%arg0: i32, %arg1: memref<8x20xf32, #tpu.memory_space<vmem>>, %arg2: memref<20x64xf32, #tpu.memory_space<vmem>>, %arg3: memref<1x64xf32, #tpu.memory_space<vmem>>, %arg4: memref<64x32xf32, #tpu.memory_space<vmem>>, %arg5: memref<1x32xf32, #tpu.memory_space<vmem>>, %arg6: memref<32x1xf32, #tpu.memory_space<vmem>>, %arg7: memref<1x1xf32, #tpu.memory_space<vmem>>, %arg8: memref<8x1xf32, #tpu.memory_space<vmem>>) attributes {dimension_semantics = [#tpu.dimension_semantics<parallel>], iteration_bounds = array<i64: 1>, scalar_prefetch = 0 : i64, scratch_operands = 0 : i64, tpu.core_type = #tpu.core_type<tc>, window_params = [{transform_indices = @transform_0, window_bounds = array<i64: 8, 20>}, {pipeline_mode = #tpu.pipeline_mode<synchronous>, transform_indices = @transform_1, window_bounds = array<i64: 20, 64>}, {pipeline_mode = #tpu.pipeline_mode<synchronous>, transform_indices = @transform_2, window_bounds = array<i64: 1, 64>}, {pipeline_mode = #tpu.pipeline_mode<synchronous>, transform_indices = @transform_3, window_bounds = array<i64: 64, 32>}, {pipeline_mode = #tpu.pipeline_mode<synchronous>, transform_indices = @transform_4, window_bounds = array<i64: 1, 32>}, {pipeline_mode = #tpu.pipeline_mode<synchronous>, transform_indices = @transform_5, window_bounds = array<i64: 32, 1>}, {pipeline_mode = #tpu.pipeline_mode<synchronous>, transform_indices = @transform_6, window_bounds = array<i64: 1, 1>}, {transform_indices = @transform_7, window_bounds = array<i64: 8, 1>}]} {
    %c0 = arith.constant 0 : index
    %c0_0 = arith.constant 0 : index
    %0 = vector.load %arg1[%c0, %c0_0] : memref<8x20xf32, #tpu.memory_space<vmem>>, vector<8x20xf32>
    %c0_1 = arith.constant 0 : index
    %c0_2 = arith.constant 0 : index
    %1 = vector.load %arg2[%c0_1, %c0_2] : memref<20x64xf32, #tpu.memory_space<vmem>>, vector<20x64xf32>
    %cst = arith.constant dense<0.000000e+00> : vector<8x64xf32>
    %2 = tpu.matmul %0, %1, %cst {dimension_numbers = #tpu.dot_dimension_numbers<[1], [0], [0], [1], [0, 0, 1, 1], [], []>} : vector<8x20xf32>, vector<20x64xf32>, vector<8x64xf32> -> vector<8x64xf32>
    %c0_3 = arith.constant 0 : index
    %c0_4 = arith.constant 0 : index
    %3 = vector.load %arg3[%c0_3, %c0_4] : memref<1x64xf32, #tpu.memory_space<vmem>>, vector<1x64xf32>
    %4 = vector.broadcast %3 : vector<1x64xf32> to vector<8x64xf32>
    %5 = arith.addf %2, %4 : vector<8x64xf32>
    %cst_5 = arith.constant 0.000000e+00 : f32
    %6 = vector.broadcast %cst_5 : f32 to vector<8x64xf32>
    %7 = arith.maximumf %5, %6 : vector<8x64xf32>
    %c0_6 = arith.constant 0 : index
    %c0_7 = arith.constant 0 : index
    %8 = vector.load %arg4[%c0_6, %c0_7] : memref<64x32xf32, #tpu.memory_space<vmem>>, vector<64x32xf32>
    %cst_8 = arith.constant dense<0.000000e+00> : vector<8x32xf32>
    %9 = tpu.matmul %7, %8, %cst_8 {dimension_numbers = #tpu.dot_dimension_numbers<[1], [0], [0], [1], [0, 0, 1, 1], [], []>} : vector<8x64xf32>, vector<64x32xf32>, vector<8x32xf32> -> vector<8x32xf32>
    %c0_9 = arith.constant 0 : index
    %c0_10 = arith.constant 0 : index
    %10 = vector.load %arg5[%c0_9, %c0_10] : memref<1x32xf32, #tpu.memory_space<vmem>>, vector<1x32xf32>
    %11 = vector.broadcast %10 : vector<1x32xf32> to vector<8x32xf32>
    %12 = arith.addf %9, %11 : vector<8x32xf32>
    %cst_11 = arith.constant 0.000000e+00 : f32
    %13 = vector.broadcast %cst_11 : f32 to vector<8x32xf32>
    %14 = arith.maximumf %12, %13 : vector<8x32xf32>
    %c0_12 = arith.constant 0 : index
    %c0_13 = arith.constant 0 : index
    %15 = vector.load %arg6[%c0_12, %c0_13] : memref<32x1xf32, #tpu.memory_space<vmem>>, vector<32x1xf32>
    %cst_14 = arith.constant dense<0.000000e+00> : vector<8x1xf32>
    %16 = tpu.matmul %14, %15, %cst_14 {dimension_numbers = #tpu.dot_dimension_numbers<[1], [0], [0], [1], [0, 0, 1, 1], [], []>} : vector<8x32xf32>, vector<32x1xf32>, vector<8x1xf32> -> vector<8x1xf32>
    %c0_15 = arith.constant 0 : index
    %c0_16 = arith.constant 0 : index
    %17 = vector.load %arg7[%c0_15, %c0_16] : memref<1x1xf32, #tpu.memory_space<vmem>>, vector<1x1xf32>
    %18 = vector.broadcast %17 : vector<1x1xf32> to vector<8x1xf32>
    %19 = arith.addf %16, %18 : vector<8x1xf32>
    %20 = arith.negf %19 : vector<8x1xf32>
    %21 = math.exp %20 : vector<8x1xf32>
    %cst_17 = arith.constant 1.000000e+00 : f32
    %22 = vector.broadcast %cst_17 : f32 to vector<8x1xf32>
    %23 = arith.addf %22, %21 : vector<8x1xf32>
    %24 = arith.divf %22, %23 : vector<8x1xf32>
    %cst_18 = arith.constant 5.000000e-01 : f32
    %25 = vector.broadcast %cst_18 : f32 to vector<8x1xf32>
    %26 = arith.addf %25, %24 : vector<8x1xf32>
    %c0_19 = arith.constant 0 : index
    %c0_20 = arith.constant 0 : index
    %27 = vector.load %arg8[%c0_19, %c0_20] : memref<8x1xf32, #tpu.memory_space<vmem>>, vector<8x1xf32>
    tpu.vector_store %arg8[%c0_19, %c0_20], %26 {strides = array<i32>} : memref<8x1xf32, #tpu.memory_space<vmem>>, vector<8x1xf32>,
    return
  }
  func.func @transform_0(%arg0: i32) -> (i32, i32) {
    %c0_i32 = arith.constant 0 : i32
    %c0_i32_0 = arith.constant 0 : i32
    return %arg0, %c0_i32 : i32, i32
  }
  func.func @transform_1(%arg0: i32) -> (i32, i32) {
    %c0_i32 = arith.constant 0 : i32
    %c0_i32_0 = arith.constant 0 : i32
    %c0_i32_1 = arith.constant 0 : i32
    return %c0_i32, %c0_i32_0 : i32, i32
  }
  func.func @transform_2(%arg0: i32) -> (i32, i32) {
    %c0_i32 = arith.constant 0 : i32
    %c0_i32_0 = arith.constant 0 : i32
    %c0_i32_1 = arith.constant 0 : i32
    return %c0_i32, %c0_i32_0 : i32, i32
  }
  func.func @transform_3(%arg0: i32) -> (i32, i32) {
    %c0_i32 = arith.constant 0 : i32
    %c0_i32_0 = arith.constant 0 : i32
    %c0_i32_1 = arith.constant 0 : i32
    return %c0_i32, %c0_i32_0 : i32, i32
  }
  func.func @transform_4(%arg0: i32) -> (i32, i32) {
    %c0_i32 = arith.constant 0 : i32
    %c0_i32_0 = arith.constant 0 : i32
    %c0_i32_1 = arith.constant 0 : i32
    return %c0_i32, %c0_i32_0 : i32, i32
  }
  func.func @transform_5(%arg0: i32) -> (i32, i32) {
    %c0_i32 = arith.constant 0 : i32
    %c0_i32_0 = arith.constant 0 : i32
    %c0_i32_1 = arith.constant 0 : i32
    return %c0_i32, %c0_i32_0 : i32, i32
  }
  func.func @transform_6(%arg0: i32) -> (i32, i32) {
    %c0_i32 = arith.constant 0 : i32
    %c0_i32_0 = arith.constant 0 : i32
    %c0_i32_1 = arith.constant 0 : i32
    return %c0_i32, %c0_i32_0 : i32, i32
  }
  func.func @transform_7(%arg0: i32) -> (i32, i32) {
    %c0_i32 = arith.constant 0 : i32
    %c0_i32_0 = arith.constant 0 : i32
    return %arg0, %c0_i32 : i32, i32
  }
}

</mosaic_0001>

<bundles_post_ra>
// kernel: position_sizer.1
= control target key start
LH: loop header
LB: loop body
LE: loop exit
PB: predicated region body
PF: predicated region fallthrough
CT: control target
= control target key end

     0   :  { %v399_v0 = vmov 0.0|0.0   ;;  %vm400_vm0 = vmmov 0   ;;  %v401_v3 = vmov 0.0   ;;  %vm43_vm1 = vcmask 1043456   ;;  %s505_s1 = inlined_call_operand.vmem [shape: f32[20,64], index: 1, kind: input, shape index: {}]   ;;  %s506_s3 = inlined_call_operand.vmem [shape: f32[64,32], index: 3, kind: input, shape index: {}]   ;;  %s507_s0 = inlined_call_operand.vmem [shape: f32[8,20], index: 0, kind: input, shape index: {}]   ;;  %s508_s5 = inlined_call_operand.vmem [shape: f32[32,1], index: 5, kind: input, shape index: {}]   ;;  %s509_s2 = inlined_call_operand.vmem [shape: f32[1,64], index: 2, kind: input, shape index: {}]   ;;  %s510_s6 = inlined_call_operand.<no memory space> [shape: f32[1,1], index: 6, kind: input, shape index: {}]   ;;  %s511_s4 = inlined_call_operand.vmem [shape: f32[1,32], index: 4, kind: input, shape index: {}]   ;;  %s512_s7 = inlined_call_operand.vmem [shape: f32[8,1], index: 7, kind: output, shape index: {}]  }
   0x1   :  { %371 = vmatprep.subr.bf16.mxu0 %v399_v0  ;;  %v29_v1 = vld [vmem:[%s505_s1] sm:$0xff]  ;;  %v30_v2 = vld [vmem:[%s505_s1 + $0x8] sm:$0xff]  ;;  %338 = vmatprep.mubr.msk.f32.mxu0 %vm400_vm0, %v401_v3  ;;  %v120_v8 = vld [vmem:[%s506_s3 + $0x10] sm:$0xff]  ;;  %vm39_vm2 = vcmask 162816   ;;  %vm133_vm3 = vcmask 523264   ;;  %v12_v30 = vstv %s510_s6  ;;  %vm219_vm4 = vcmask 261120  }
   0x2   :  { %v372_v4 = vpack.c.bf16 %v30_v2, %v29_v1  ;;  %374 = vmatprep.subr.bf16.mxu1 %v399_v0  ;;  %v118_v5 = vld [vmem:[%s506_s3] sm:$0xff]  ;;  %v119_v6 = vld [vmem:[%s506_s3 + $0x8] sm:$0xff]  ;;  %357 = vmatprep.mubr.msk.f32.mxu1 %vm400_vm0, %v401_v3  ;;  %v121_v9 = vld [vmem:[%s506_s3 + $0x18] sm:$0xff]  ;;  %13 = vst [vmem:[#allocation2] sm:$0x1] %v12_v30  ;;  %vm300_vm5 = vcmask 7168  }
   0x3   :  { %v375_v7 = vpack.c.bf16 %v119_v6, %v118_v5  ;;  %v31_v10 = vld [vmem:[%s505_s1 + $0x10] sm:$0xf]  ;;  %v378_v11 = vpack.c.bf16 %v121_v9, %v120_v8  ;;  %v28_v12 = vld [vmem:[%s507_s0] sm:$0xff]  ;;  %v123_v14 = vld [vmem:[%s506_s3 + $0x28] sm:$0xff] }
   0x4   :  { %373 = vmatpush3.bf16.msra.mxu0 %v372_v4  ;;  %v122_v13 = vld [vmem:[%s506_s3 + $0x20] sm:$0xff]  ;;  %v124_v16 = vld [vmem:[%s506_s3 + $0x30] sm:$0xff]  ;;  %v125_v17 = vld [vmem:[%s506_s3 + $0x38] sm:$0xff] }
   0x5   :  { %336 = vmatprep.subr.mxu0 %v401_v3  ;;  %376 = vmatpush3.bf16.msra.mxu1 %v375_v7  ;;  %v381_v15 = vpack.c.bf16 %v123_v14, %v122_v13  ;;  %v384_v18 = vpack.c.bf16 %v125_v17, %v124_v16  ;;  %v208_v19 = vld [vmem:[%s508_s5] sm:$0xff]  ;;  %v209_v20 = vld [vmem:[%s508_s5 + $0x8] sm:$0xff]  ;;  %v210_v27 = vld [vmem:[%s508_s5 + $0x10] sm:$0xff] }
   0x6   :  { %377 = vmatprep.subr.bf16.mxu1 %v399_v0  ;;  %v387_v21 = vpack.c.bf16 %v209_v20, %v208_v19  ;;  %v306_v22 = vld [vmem:[%s509_s2] ss:$0 sm:$0xff]  ;;  %v211_v28 = vld [vmem:[%s508_s5 + $0x18] sm:$0xff] }
   0x7   :  { %v390_v29 = vpack.c.bf16 %v211_v28, %v210_v27  ;;  %v309_v31 = vld [vmem:[%s511_s4] ss:$0 sm:$0xff] }
   0x8   :  { %337 = vmatpush3.msk.msra.mxu0 %vm43_vm1, %v31_v10 }
   0x9   :  { %339 = vmatmul.mubr.msk.f32.vlgmr.msra.gmra.mrb[0].mxu0 %vm39_vm2, %v28_v12  ;;  %379 = vmatpush3.bf16.msra.mxu1 %v378_v11  ;;  %v311_v36 = vld [vmem:[#allocation2] ss:$0 sm:$0xff] }
   0xa   :  { %380 = vmatprep.subr.bf16.mxu1 %v399_v0  ;;  %386 = vmatprep.subr.bf16.mxu0 %v399_v0 }
   0xb   :  { %368 = vmatprep.mubr.msk.f32.mxu0 %vm400_vm0, %v401_v3  ;;  %388 = vmatpush3.bf16.msra.mxu0 %v387_v21 }
   0xc   :  { %389 = vmatprep.subr.bf16.mxu0 %v399_v0 }
   0xd   :  { %382 = vmatpush3.bf16.msra.mxu1 %v381_v15 }
   0xe   :  { %383 = vmatprep.subr.bf16.mxu1 %v399_v0 }
   0xf   :  { %391 = vmatpush3.bf16.msra.mxu0 %v390_v29 }
  0x11   :  { %385 = vmatpush3.bf16.msra.mxu1 %v384_v18 }
  0xdc   :  { %v113_v23 = vpop.f32.mrb[0].mxu0 }
  0xdd   :  { %v114_v24 = vadd.f32 %v306_v22, %v113_v23  ;;  %v340_v25 = vpop.f32.mrb[1].mxu0 }
  0xdf   :  { %v117_v26 = vmax.f32 %v114_v24, 0.0 }
  0xe1   :  { %358 = vmatmul.mubr.msk.f32.vlgmr.msra.gmra.mrb[0].mxu1 %vm133_vm3, %v117_v26 }
 0x1b4   :  { %v203_v32 = vpop.f32.mrb[0].mxu1 }
 0x1b5   :  { %v204_v33 = vadd.f32 %v309_v31, %v203_v32  ;;  %v359_v34 = vpop.f32.mrb[1].mxu1 }
 0x1b7   :  { %v207_v35 = vmax.f32 %v204_v33, 0.0 }
 0x1b9   :  { %369 = vmatmul.mubr.msk.f32.vlgmr.msra.gmra.mrb[2].mxu0 %vm219_vm4, %v207_v35 }
 0x28c   :  { %v289_v37 = vpop.f32.mrb[2].mxu0 }
 0x28d   :  { %v290_v38 = vadd.f32 %v311_v36, %v289_v37  ;;  %v370_v39 = vpop.f32.mrb[3].mxu0 }
 0x28f   :  { %v313_v40 = vmul.f32 -1.442695, %v290_v38 }
 0x291   :  { %395 = vpow2.f32 %v313_v40 }
 0x29b   :  { %v396_v41 = vpop.eup %395 }
 0x29c   :  { %v296_v42 = vadd.f32 1.0, %v396_v41 }
 0x29e   :  { %397 = vrcp.f32 %v296_v42 }
 0x2a8   :  { %v398_v43 = vpop.eup %397 }
 0x2a9   :  { %v299_v44 = vadd.f32 0.5, %v398_v43 }
 0x2ab   :  { %301 = vst.msk [vmem:[%s512_s7] sm:$0xff] %vm300_vm5, %v299_v44 }

</bundles_post_ra>
